<compile_context>
chip_gen: v6e
topology: v6e:2x2x1
jax: 0.10.0
libtpu: 0.0.40
codegen_flags: <defaults>
</compile_context>

<pallas_src>
import jax
import jax.numpy as jnp
from jax.experimental import pallas as pl
from jax.experimental.pallas import tpu as pltpu

BN_EPS = 1e-5       # PyTorch BatchNorm1d default eps
_OUT_PAD = 128      # fc3 output width padded 4 -> 128 (lane-dense store)


def _head_kernel(img_ref, txt_ref, w_img_ref, w_txt_ref, bias_ref, out_ref):
    """out = img @ M_img + txt @ M_txt + b_total  (whole head, collapsed)."""
    bf16 = jnp.bfloat16
    f32 = jnp.float32
    acc = jnp.dot(img_ref[...].astype(bf16), w_img_ref[...],
                  preferred_element_type=f32)
    acc = acc + jnp.dot(txt_ref[...].astype(bf16), w_txt_ref[...],
                        preferred_element_type=f32)
    out_ref[...] = acc + bias_ref[...]


def multimodal_head(img_feat, txt_feat, prepared):
    """Runs the fused head. img_feat: (B, 2048) f32, txt_feat: (B, 768) f32."""
    B = img_feat.shape[0]
    Bp = max(8, ((B + 7) // 8) * 8)          # pad sublane dim to (8, 128) tile
    if Bp != B:
        img_feat = jnp.pad(img_feat, ((0, Bp - B), (0, 0)))
        txt_feat = jnp.pad(txt_feat, ((0, Bp - B), (0, 0)))

    inputs = (img_feat, txt_feat,
              prepared["m_img"], prepared["m_txt"], prepared["bias"])

    vmem_spec = pl.BlockSpec(memory_space=pltpu.MemorySpace.VMEM)
    out = pl.pallas_call(
        _head_kernel,
        out_shape=jax.ShapeDtypeStruct((Bp, _OUT_PAD), jnp.float32),
        in_specs=[vmem_spec] * len(inputs),
        out_specs=vmem_spec,
        compiler_params=pltpu.CompilerParams(vmem_limit_bytes=8 << 20),
    )(*inputs)
    return out[:B, :4]


def init_params(key):
    """Raw (PyTorch-equivalent) parameters, f32, weights as (in, out)."""
    ks = jax.random.split(key, 5)

    def linear(k, fan_in, fan_out):
        # PyTorch nn.Linear default init: U(-1/sqrt(fan_in), 1/sqrt(fan_in))
        scale = 1.0 / (fan_in ** 0.5)
        kw, kb = jax.random.split(k)
        w = jax.random.uniform(kw, (fan_in, fan_out), jnp.float32, -scale, scale)
        b = jax.random.uniform(kb, (1, fan_out), jnp.float32, -scale, scale)
        return w, b

    w_img, b_img = linear(ks[0], 2048, 512)   # resnet.fc
    w_txt, b_txt = linear(ks[1], 768, 512)    # bert_fc
    w1, b1 = linear(ks[2], 1024, 512)         # fc1
    w2, b2 = linear(ks[3], 512, 256)          # fc2
    w3, b3 = linear(ks[4], 256, 4)            # fc3

    ones = lambda n: jnp.ones((1, n), jnp.float32)
    zeros = lambda n: jnp.zeros((1, n), jnp.float32)

    return dict(
        w_img=w_img, b_img=b_img,
        w_txt=w_txt, b_txt=b_txt,
        w1_img=w1[:512], w1_txt=w1[512:], b1=b1,
        g1=ones(512), beta1=zeros(512), m1=zeros(512), v1=ones(512),
        w2=w2, b2=b2,
        g2=ones(256), beta2=zeros(256), m2=zeros(256), v2=ones(256),
        w3=w3, b3=b3,
    )


def prepare_params(p):
    """Host-side prep: fold eval-mode BatchNorm into fc1/fc2 and then collapse
    the entire affine head into two matrices (img / txt branch) plus one bias,
    all in f32; pad the 4-wide output to 128 lanes; cast the collapsed weight
    matrices to bf16 (single rounding step, halves HBM weight traffic)."""
    # --- BN folding (eval mode, exact) ---
    s1 = p["g1"] * jax.lax.rsqrt(p["v1"] + BN_EPS)        # (1, 512)
    s2 = p["g2"] * jax.lax.rsqrt(p["v2"] + BN_EPS)        # (1, 256)

    w1a = p["w1_img"] * s1                                # (512, 512)
    w1b = p["w1_txt"] * s1                                # (512, 512)
    b1 = (p["b1"] - p["m1"]) * s1 + p["beta1"]            # (1, 512)

    w2 = p["w2"] * s2                                     # (512, 256)
    b2 = (p["b2"] - p["m2"]) * s2 + p["beta2"]            # (1, 256)

    # --- full affine collapse (dropout is identity in eval) ---
    # out = ((img@W_img + b_img)@W1a + (txt@W_txt + b_txt)@W1b + b1)@W2' + b2')@W3 + b3
    w23 = w2 @ p["w3"]                                    # (512, 4)
    m_img = p["w_img"] @ (w1a @ w23)                      # (2048, 4)
    m_txt = p["w_txt"] @ (w1b @ w23)                      # (768, 4)
    b_total = ((p["b_img"] @ w1a + p["b_txt"] @ w1b + b1) @ w23
               + b2 @ p["w3"] + p["b3"])                  # (1, 4)

    # --- pad to lane-dense 128-wide output (zero cols / zero bias tail) ---
    m_img_p = jnp.zeros((2048, _OUT_PAD), jnp.float32).at[:, :4].set(m_img)
    m_txt_p = jnp.zeros((768, _OUT_PAD), jnp.float32).at[:, :4].set(m_txt)
    bias_p = jnp.zeros((1, _OUT_PAD), jnp.float32).at[:, :4].set(b_total)

    return dict(
        m_img=m_img_p.astype(jnp.bfloat16),
        m_txt=m_txt_p.astype(jnp.bfloat16),
        bias=bias_p,                                      # keep bias in f32
    )


def reference(img_feat, txt_feat, p):
    """Pure-JAX f32 reference matching the PyTorch module's eval forward."""
    img_h = img_feat @ p["w_img"] + p["b_img"]
    txt_h = txt_feat @ p["w_txt"] + p["b_txt"]
    h = img_h @ p["w1_img"] + txt_h @ p["w1_txt"] + p["b1"]            # fc1
    h = (h - p["m1"]) / jnp.sqrt(p["v1"] + BN_EPS) * p["g1"] + p["beta1"]
    h = h @ p["w2"] + p["b2"]                                          # fc2
    h = (h - p["m2"]) / jnp.sqrt(p["v2"] + BN_EPS) * p["g2"] + p["beta2"]
    return h @ p["w3"] + p["b3"]                                       # fc3


if __name__ == "__main__":
    key = jax.random.PRNGKey(0)
    k_img, k_txt, k_par = jax.random.split(key, 3)

    B = 2
    # Backbone outputs (see TODO(synk) above): ResNet50 pooled feats & BERT
    # pooler_output.
    image_features = jax.random.normal(k_img, (B, 2048), jnp.float32)
    text_pooled = jax.random.normal(k_txt, (B, 768), jnp.float32)

    raw = init_params(k_par)
    prepared = prepare_params(raw)

    out = multimodal_head(image_features, text_pooled, prepared)
    out = jax.block_until_ready(out)

    ref = reference(image_features, text_pooled, raw)
    assert out.shape == (B, 4)
    # bf16 collapsed weights / bf16 activation casts vs. pure-f32 reference.
    assert jnp.allclose(out, ref, atol=3e-2, rtol=3e-2), \
        f"max abs err {jnp.max(jnp.abs(out - ref))}"

    print("KERNEL_OK")
</pallas_src>

<mosaic_0001>
module attributes {stable_mosaic.version = 11 : i64} {
  func.func @_head_kernel(%arg0: memref<8x2048xf32, #tpu.memory_space<vmem>>, %arg1: memref<8x768xf32, #tpu.memory_space<vmem>>, %arg2: memref<2048x128xbf16, #tpu.memory_space<vmem>>, %arg3: memref<768x128xbf16, #tpu.memory_space<vmem>>, %arg4: memref<1x128xf32, #tpu.memory_space<vmem>>, %arg5: memref<8x128xf32, #tpu.memory_space<vmem>>) attributes {dimension_semantics = [], scalar_prefetch = 0 : i64, scratch_operands = 0 : i64, tpu.core_type = #tpu.core_type<tc>} {
    %c0 = arith.constant 0 : index
    %c0_0 = arith.constant 0 : index
    %0 = vector.load %arg0[%c0, %c0_0] : memref<8x2048xf32, #tpu.memory_space<vmem>>, vector<8x2048xf32>
    %1 = arith.truncf %0 : vector<8x2048xf32> to vector<8x2048xbf16>
    %c0_1 = arith.constant 0 : index
    %c0_2 = arith.constant 0 : index
    %2 = vector.load %arg2[%c0_1, %c0_2] : memref<2048x128xbf16, #tpu.memory_space<vmem>>, vector<2048x128xbf16>
    %cst = arith.constant dense<0.000000e+00> : vector<8x128xf32>
    %3 = tpu.matmul %1, %2, %cst {dimension_numbers = #tpu.dot_dimension_numbers<[1], [0], [0], [1], [0, 0, 1, 1], [], []>} : vector<8x2048xbf16>, vector<2048x128xbf16>, vector<8x128xf32> -> vector<8x128xf32>
    %c0_3 = arith.constant 0 : index
    %c0_4 = arith.constant 0 : index
    %4 = vector.load %arg1[%c0_3, %c0_4] : memref<8x768xf32, #tpu.memory_space<vmem>>, vector<8x768xf32>
    %5 = arith.truncf %4 : vector<8x768xf32> to vector<8x768xbf16>
    %c0_5 = arith.constant 0 : index
    %c0_6 = arith.constant 0 : index
    %6 = vector.load %arg3[%c0_5, %c0_6] : memref<768x128xbf16, #tpu.memory_space<vmem>>, vector<768x128xbf16>
    %cst_7 = arith.constant dense<0.000000e+00> : vector<8x128xf32>
    %7 = tpu.matmul %5, %6, %cst_7 {dimension_numbers = #tpu.dot_dimension_numbers<[1], [0], [0], [1], [0, 0, 1, 1], [], []>} : vector<8x768xbf16>, vector<768x128xbf16>, vector<8x128xf32> -> vector<8x128xf32>
    %8 = arith.addf %3, %7 : vector<8x128xf32>
    %c0_8 = arith.constant 0 : index
    %c0_9 = arith.constant 0 : index
    %9 = vector.load %arg4[%c0_8, %c0_9] : memref<1x128xf32, #tpu.memory_space<vmem>>, vector<1x128xf32>
    %10 = vector.broadcast %9 : vector<1x128xf32> to vector<8x128xf32>
    %11 = arith.addf %8, %10 : vector<8x128xf32>
    %c0_10 = arith.constant 0 : index
    %c0_11 = arith.constant 0 : index
    %12 = vector.load %arg5[%c0_10, %c0_11] : memref<8x128xf32, #tpu.memory_space<vmem>>, vector<8x128xf32>
    tpu.vector_store %arg5[%c0_10, %c0_11], %11 {strides = array<i32>} : memref<8x128xf32, #tpu.memory_space<vmem>>, vector<8x128xf32>,
    return
  }
}

</mosaic_0001>

<bundles_post_ra>
// kernel: tpu_custom_call.1
= control target key start
LH: loop header
LB: loop body
LE: loop exit
PB: predicated region body
PF: predicated region fallthrough
CT: control target
= control target key end

     0   :  { %10 = vsyncpa [#allocation3], 0  ;;  %s2756_s0 = inlined_call_operand.hbm [shape: f32[8,2048], index: 0, kind: input, shape index: {}]   ;;  %s2757_s1 = inlined_call_operand.hbm [shape: f32[8,768], index: 1, kind: input, shape index: {}]   ;;  %s2758_s2 = inlined_call_operand.hbm [shape: bf16[2048,128], index: 2, kind: input, shape index: {}]   ;;  %s2759_s3 = inlined_call_operand.hbm [shape: bf16[768,128], index: 3, kind: input, shape index: {}]   ;;  %s2760_s4 = inlined_call_operand.vmem [shape: f32[1,128], index: 4, kind: input, shape index: {}]   ;;  %s2761_s5 = inlined_call_operand.hbm [shape: f32[8,128], index: 5, kind: output, shape index: {}]  }
   0x1   :  { %11 = vsyncpa [#allocation6], 0 }
   0x2   :  { %12 = vsyncpa [#allocation9], 0 }
   0x3   :  { %13 = vsyncpa [#allocation4], 0  ;;  %s2701_s18 = smov [#allocation5]   ;;  %s2702_s20 = smov [#allocation2]  }
   0x4   :  { %s30_s19 = sshll.u32 %s2701_s18, 4  ;;  %s20_s21 = sshll.u32 %s2702_s20, 4  ;;  %s31_s19 = int_to_ptr.vmem [resolvable:$true] %s30_s19  ;;  %s21_s21 = int_to_ptr.vmem [resolvable:$true] %s20_s21 }
   0x5   :  { %s2601_s22 = scalar_lea.vmem %s31_s19, 768  ;;  %p2606_p1 = scmp.lt.s32.totalorder %s31_s19, %s31_s19 }
   0x6   :  { %p2602_p0 = scmp.ne.s32.totalorder %s31_s19, %s2601_s22  ;;  %p2607_p2 = scmp.lt.s32.totalorder %s2601_s22, %s2601_s22 }
   0x8   :  { %p2608_p3 = por %p2607_p2, %p2606_p1 }
   0xa   :  { %p2609_p4 = pnand %p2608_p3, %p2602_p0 }
   0xc   :  { %2612 = shalt.err (!%p2609_p4)
}
   0xd   :  { %33 = dma.hbm_to_vmem [thread:$0]  %s2757_s1, 768, %s31_s19, [#allocation6]  }
   0xe   :  { %s2621_s25 = scalar_lea.vmem %s21_s21, 2048  ;;  %p2626_p6 = scmp.lt.s32.totalorder %s21_s21, %s21_s21 }
   0xf   :  { %p2622_p5 = scmp.ne.s32.totalorder %s21_s21, %s2621_s25  ;;  %p2627_p7 = scmp.lt.s32.totalorder %s2621_s25, %s2621_s25 }
  0x11   :  { %p2628_p8 = por %p2627_p7, %p2626_p6 }
  0x13   :  { %p2629_p9 = pnand %p2628_p8, %p2622_p5 }
  0x15   :  { %2632 = shalt.err (!%p2629_p9)
}
  0x16   :  { %23 = dma.hbm_to_vmem [thread:$0]  %s2756_s0, 2048, %s21_s21, [#allocation3]  }
  0x17   :  { %s2703_s28 = smov [#allocation7]  }
  0x18   :  { %s39_s29 = sshll.u32 %s2703_s28, 4  ;;  %s40_s29 = int_to_ptr.vmem [resolvable:$true] %s39_s29 }
  0x19   :  { %s2641_s30 = scalar_lea.vmem %s40_s29, 16384  ;;  %p2646_p11 = scmp.lt.s32.totalorder %s40_s29, %s40_s29 }
  0x1a   :  { %p2642_p10 = scmp.ne.s32.totalorder %s40_s29, %s2641_s30  ;;  %p2647_p12 = scmp.lt.s32.totalorder %s2641_s30, %s2641_s30 }
  0x1c   :  { %p2648_p13 = por %p2647_p12, %p2646_p11 }
  0x1e   :  { %p2649_p0 = pnand %p2648_p13, %p2642_p10 }
  0x20   :  { %2652 = shalt.err (!%p2649_p0)
}
  0x21   :  { %s2704_s1 = smov 64   ;;  %s2705_s6 = smov 4  }
  0x22   :  { %45 = dma.hbm_to_vmem [thread:$0]  %s2758_s2, 16384, %s40_s29, [#allocation6], %s2704_s1, %s2704_s1, %s2705_s6  }
  0x23   :  { %s2706_s9 = smov [#allocation8]  }
  0x24   :  { %s51_s10 = sshll.u32 %s2706_s9, 4  ;;  %s52_s10 = int_to_ptr.vmem [resolvable:$true] %s51_s10 }
  0x25   :  { %s2661_s0 = scalar_lea.vmem %s52_s10, 6144  ;;  %p2666_p2 = scmp.lt.s32.totalorder %s52_s10, %s52_s10 }
  0x26   :  { %p2662_p1 = scmp.ne.s32.totalorder %s52_s10, %s2661_s0  ;;  %p2667_p3 = scmp.lt.s32.totalorder %s2661_s0, %s2661_s0 }
  0x28   :  { %p2668_p4 = por %p2667_p3, %p2666_p2 }
  0x2a   :  { %p2669_p5 = pnand %p2668_p4, %p2662_p1 }
  0x2c   :  { %2672 = shalt.err (!%p2669_p5)
}
  0x2d   :  { %57 = dma.hbm_to_vmem [thread:$0]  %s2759_s3, 6144, %s52_s10, [#allocation9], %s2704_s1, %s2704_s1, %s2705_s6  }
  0x2e   :  { %2693 = dma.done.wait [#allocation3], 2048  }
  0x2f   :  { %2694 = vsyncadd [#allocation3], 4294965248 }
  0x30   :  { %2695 = dma.done.wait [#allocation6], 17152  }
  0x31   :  { %2696 = vsyncadd [#allocation6], 4294950144 }
  0x32   :  { %2697 = dma.done.wait [#allocation9], 6144  }
  0x33   :  { %2698 = vsyncadd [#allocation9], 4294961152  ;;  %v2417_v0 = vld [vmem:[#allocation8 + $0x78] sm:$0xff]   ;;  %v2421_v4 = vld [vmem:[#allocation8 + $0x70] sm:$0xff]   ;;  %s2707_s13 = smov [#allocation10]  }
  0x34   :  { %v2418_v1 = vld [vmem:[#allocation8 + $0xf8] sm:$0xff]   ;;  %2168 = vmatprep.subr.bf16.mxu0 %v2417_v0  ;;  %v2422_v5 = vld [vmem:[#allocation8 + $0xf0] sm:$0xff]   ;;  %v2425_v8 = vld [vmem:[#allocation8 + $0x68] sm:$0xff]   ;;  %s1980_s14 = sshll.u32 %s2707_s13, 4  ;;  %s1981_s14 = int_to_ptr.vmem [resolvable:$true] %s1980_s14 }
  0x35   :  { %v2419_v2 = vld [vmem:[#allocation8 + $0x38] sm:$0xff]   ;;  %2190 = vmatprep.subr.bf16.mxu1 %v2418_v1  ;;  %v2423_v6 = vld [vmem:[#allocation8 + $0x30] sm:$0xff]   ;;  %v2426_v9 = vld [vmem:[#allocation8 + $0xe8] sm:$0xff]   ;;  %s2673_s15 = scalar_lea.vmem %s1981_s14, 128  ;;  %p2678_p7 = scmp.lt.s32.totalorder %s1981_s14, %s1981_s14 }
  0x36   :  { %v2420_v3 = vld [vmem:[#allocation8 + $0xb8] sm:$0xff]   ;;  %2169 = vmatpush3.bf16.msra.mxu0 %v2419_v2  ;;  %v2424_v7 = vld [vmem:[#allocation8 + $0xb0] sm:$0xff]   ;;  %v2427_v10 = vld [vmem:[#allocation8 + $0x28] sm:$0xff]   ;;  %p2674_p6 = scmp.ne.s32.totalorder %s1981_s14, %s2673_s15  ;;  %p2679_p8 = scmp.lt.s32.totalorder %s2673_s15, %s2673_s15 }
  0x37   :  { %2191 = vmatpush3.bf16.msra.mxu1 %v2420_v3  ;;  %2170 = vmatprep.subr.bf16.mxu0 %v2421_v4  ;;  %v2428_v11 = vld [vmem:[#allocation8 + $0xa8] sm:$0xff]   ;;  %v2429_v12 = vld [vmem:[#allocation8 + $0x60] sm:$0xff]   ;;  %v2433_v16 = vld [vmem:[#allocation8 + $0x58] sm:$0xff]  }
  0x38   :  { %2192 = vmatprep.subr.bf16.mxu1 %v2422_v5  ;;  %v2430_v13 = vld [vmem:[#allocation8 + $0xe0] sm:$0xff]   ;;  %v2434_v17 = vld [vmem:[#allocation8 + $0xd8] sm:$0xff]   ;;  %v2437_v20 = vld [vmem:[#allocation8 + $0x50] sm:$0xff]   ;;  %p2680_p9 = por %p2679_p8, %p2678_p7 }
  0x39   :  { %v2431_v14 = vld [vmem:[#allocation8 + $0x20] sm:$0xff]   ;;  %v2435_v18 = vld [vmem:[#allocation8 + $0x18] sm:$0xff]   ;;  %v2438_v21 = vld [vmem:[#allocation8 + $0xd0] sm:$0xff]  }
  0x3a   :  { %2171 = vmatpush3.bf16.msra.mxu0 %v2423_v6  ;;  %v2432_v15 = vld [vmem:[#allocation8 + $0xa0] sm:$0xff]   ;;  %v2436_v19 = vld [vmem:[#allocation8 + $0x98] sm:$0xff]   ;;  %v2439_v22 = vld [vmem:[#allocation8 + $0x10] sm:$0xff]   ;;  %p2681_p10 = pnand %p2680_p9, %p2674_p6 }
  0x3b   :  { %2193 = vmatpush3.bf16.msra.mxu1 %v2424_v7  ;;  %2172 = vmatprep.subr.bf16.mxu0 %v2425_v8  ;;  %v2440_v23 = vld [vmem:[#allocation8 + $0x90] sm:$0xff]   ;;  %v2441_v24 = vld [vmem:[#allocation8 + $0x48] sm:$0xff]   ;;  %v2445_v28 = vld [vmem:[#allocation8 + $0x40] sm:$0xff]  }
  0x3c   :  { %2194 = vmatprep.subr.bf16.mxu1 %v2426_v9  ;;  %v2442_v25 = vld [vmem:[#allocation8 + $0xc8] sm:$0xff]   ;;  %v2446_v29 = vld [vmem:[#allocation8 + $0xc0] sm:$0xff]   ;;  %v362_v32 = vld [vmem:[#allocation5 + $0x8] sm:$0xff] }
  0x3d   :  { %v2443_v26 = vld [vmem:[#allocation8 + $0x8] sm:$0xff]   ;;  %v2447_v30 = vld [vmem:[#allocation8] sm:$0xff]   ;;  %v361_v34 = vld [vmem:[#allocation5] sm:$0xff]  ;;  %v368_v35 = vpack.c.bf16 %v362_v32, %v362_v32 }
  0x3e   :  { %2173 = vmatpush3.bf16.msra.mxu0 %v2427_v10  ;;  %v2444_v27 = vld [vmem:[#allocation8 + $0x88] sm:$0xff]   ;;  %v2448_v31 = vld [vmem:[#allocation8 + $0x80] sm:$0xff]   ;;  %v367_v37 = vpack.c.bf16 %v361_v34, %v361_v34  ;;  %v2449_v40 = vld [vmem:[#allocation8 + $0x178] sm:$0xff]  }
  0x3f   :  { %2195 = vmatpush3.bf16.msra.mxu1 %v2428_v11  ;;  %2174 = vmatprep.subr.bf16.mxu0 %v2429_v12  ;;  %v364_v33 = vld [vmem:[#allocation5 + $0x18] sm:$0xff]  ;;  %v363_v38 = vld [vmem:[#allocation5 + $0x10] sm:$0xff]  ;;  %v2450_v41 = vld [vmem:[#allocation8 + $0x138] sm:$0xff]  }
  0x40   :  { %2196 = vmatprep.subr.bf16.mxu1 %v2430_v13  ;;  %v370_v36 = vpack.c.bf16 %v364_v33, %v364_v33  ;;  %v369_v39 = vpack.c.bf16 %v363_v38, %v363_v38  ;;  %789 = vmatprep.mubr.bf16.mxu0 %v368_v35  ;;  %v2451_v42 = vld [vmem:[#allocation7 + $0x78] sm:$0xff]   ;;  %v2453_v44 = vld [vmem:[#allocation8 + $0x170] sm:$0xff]   ;;  %v2457_v48 = vld [vmem:[#allocation8 + $0x168] sm:$0xff]  }
  0x41   :  { %v2452_v43 = vld [vmem:[#allocation7 + $0x38] sm:$0xff]   ;;  %v2454_v45 = vld [vmem:[#allocation8 + $0x130] sm:$0xff]   ;;  %v2458_v49 = vld [vmem:[#allocation8 + $0x128] sm:$0xff]  }
  0x42   :  { %2175 = vmatpush3.bf16.msra.mxu0 %v2431_v14  ;;  %829 = vmatprep.mubr.bf16.mxu1 %v370_v36  ;;  %v2455_v46 = vld [vmem:[#allocation7 + $0x70] sm:$0xff]   ;;  %v2459_v50 = vld [vmem:[#allocation7 + $0x68] sm:$0xff]   ;;  %v2461_v52 = vld [vmem:[#allocation8 + $0x160] sm:$0xff]  }
  0x43   :  { %2197 = vmatpush3.bf16.msra.mxu1 %v2432_v15  ;;  %2176 = vmatprep.subr.bf16.mxu0 %v2433_v16  ;;  %v2456_v47 = vld [vmem:[#allocation7 + $0x30] sm:$0xff]   ;;  %v2460_v51 = vld [vmem:[#allocation7 + $0x28] sm:$0xff]   ;;  %v2462_v53 = vld [vmem:[#allocation8 + $0x120] sm:$0xff]  }
  0x44   :  { %2198 = vmatprep.subr.bf16.mxu1 %v2434_v17  ;;  %v2463_v54 = vld [vmem:[#allocation7 + $0x60] sm:$0xff]   ;;  %v2465_v56 = vld [vmem:[#allocation8 + $0x158] sm:$0xff]   ;;  %v2469_v60 = vld [vmem:[#allocation8 + $0x150] sm:$0xff]  }
  0x45   :  { %v2464_v55 = vld [vmem:[#allocation7 + $0x20] sm:$0xff]   ;;  %v2466_v57 = vld [vmem:[#allocation8 + $0x118] sm:$0xff]   ;;  %v2470_v61 = vld [vmem:[#allocation8 + $0x110] sm:$0xff]  }
  0x46   :  { %2177 = vmatpush3.bf16.msra.mxu0 %v2435_v18  ;;  %v2467_v58 = vld [vmem:[#allocation7 + $0x58] sm:$0xff]   ;;  %v2471_v62 = vld [vmem:[#allocation7 + $0x50] sm:$0xff]   ;;  %v2473_v0 = vld [vmem:[#allocation8 + $0x148] sm:$0xff]  }
  0x47   :  { %2199 = vmatpush3.bf16.msra.mxu1 %v2436_v19  ;;  %2178 = vmatprep.subr.bf16.mxu0 %v2437_v20  ;;  %v2468_v59 = vld [vmem:[#allocation7 + $0x18] sm:$0xff]   ;;  %v2472_v63 = vld [vmem:[#allocation7 + $0x10] sm:$0xff]   ;;  %v2474_v1 = vld [vmem:[#allocation8 + $0x108] sm:$0xff]  }
  0x48   :  { %2200 = vmatprep.subr.bf16.mxu1 %v2438_v21  ;;  %v2475_v2 = vld [vmem:[#allocation7 + $0x48] sm:$0xff]   ;;  %v2477_v4 = vld [vmem:[#allocation8 + $0x140] sm:$0xff]   ;;  %v366_v7 = vld [vmem:[#allocation5 + $0x28] sm:$0xff] }
  0x49   :  { %v2476_v3 = vld [vmem:[#allocation7 + $0x8] sm:$0xff]   ;;  %v2478_v5 = vld [vmem:[#allocation8 + $0x100] sm:$0xff]   ;;  %v372_v8 = vpack.c.bf16 %v366_v7, %v366_v7  ;;  %v365_v10 = vld [vmem:[#allocation5 + $0x20] sm:$0xff] }
  0x4a   :  { %2179 = vmatpush3.bf16.msra.mxu0 %v2439_v22  ;;  %v2479_v6 = vld [vmem:[#allocation7 + $0x40] sm:$0xff]   ;;  %v371_v11 = vpack.c.bf16 %v365_v10, %v365_v10  ;;  %v2481_v12 = vld [vmem:[#allocation7 + $0xf8] sm:$0xff]   ;;  %v73_v16 = vld [vmem:[#allocation2] sm:$0xff] }
  0x4b   :  { %2201 = vmatpush3.bf16.msra.mxu1 %v2440_v23  ;;  %2180 = vmatprep.subr.bf16.mxu0 %v2441_v24  ;;  %v2480_v9 = vld [vmem:[#allocation7] sm:$0xff]   ;;  %v74_v13 = vld [vmem:[#allocation2 + $0x8] sm:$0xff]  ;;  %v89_v17 = vpack.c.bf16 %v73_v16, %v73_v16  ;;  %v2485_v20 = vld [vmem:[#allocation7 + $0xf0] sm:$0xff]  }
  0x4c   :  { %2202 = vmatprep.subr.bf16.mxu1 %v2442_v25  ;;  %v90_v14 = vpack.c.bf16 %v74_v13, %v74_v13  ;;  %v2482_v15 = vld [vmem:[#allocation7 + $0xb8] sm:$0xff]   ;;  %v2486_v21 = vld [vmem:[#allocation7 + $0xb0] sm:$0xff]   ;;  %v2489_v24 = vld [vmem:[#allocation7 + $0xe8] sm:$0xff]  }
  0x4d   :  { %v2483_v18 = vld [vmem:[#allocation7 + $0x178] sm:$0xff]   ;;  %v2487_v22 = vld [vmem:[#allocation7 + $0x170] sm:$0xff]   ;;  %v2490_v25 = vld [vmem:[#allocation7 + $0xa8] sm:$0xff]  }
  0x4e   :  { %2181 = vmatpush3.bf16.msra.mxu0 %v2443_v26  ;;  %v2484_v19 = vld [vmem:[#allocation7 + $0x138] sm:$0xff]   ;;  %v2488_v23 = vld [vmem:[#allocation7 + $0x130] sm:$0xff]   ;;  %v2491_v26 = vld [vmem:[#allocation7 + $0x168] sm:$0xff]  }
  0x4f   :  { %2203 = vmatpush3.bf16.msra.mxu1 %v2444_v27  ;;  %2182 = vmatprep.subr.bf16.mxu0 %v2445_v28  ;;  %v2492_v27 = vld [vmem:[#allocation7 + $0x128] sm:$0xff]   ;;  %v2493_v28 = vld [vmem:[#allocation7 + $0xe0] sm:$0xff]   ;;  %v2497_v32 = vld [vmem:[#allocation7 + $0xd8] sm:$0xff]  }
  0x50   :  { %2204 = vmatprep.subr.bf16.mxu1 %v2446_v29  ;;  %v2494_v29 = vld [vmem:[#allocation7 + $0xa0] sm:$0xff]   ;;  %v2498_v33 = vld [vmem:[#allocation7 + $0x98] sm:$0xff]   ;;  %v2501_v36 = vld [vmem:[#allocation7 + $0xd0] sm:$0xff]  }
  0x51   :  { %v2499_v34 = vld [vmem:[#allocation7 + $0x158] sm:$0xff]   ;;  %v2503_v38 = vld [vmem:[#allocation7 + $0x150] sm:$0xff]   ;;  %v2528_v7 = vld [vmem:[#allocation7 + $0x220] sm:$0xff]  }
  0x52   :  { %2183 = vmatpush3.bf16.msra.mxu0 %v2447_v30  ;;  %v2495_v30 = vld [vmem:[#allocation7 + $0x160] sm:$0xff]   ;;  %v2500_v35 = vld [vmem:[#allocation7 + $0x118] sm:$0xff]   ;;  %v2534_v13 = vld [vmem:[#allocation7 + $0x190] sm:$0xff]  }
  0x53   :  { %2205 = vmatpush3.bf16.msra.mxu1 %v2448_v31  ;;  %2212 = vmatprep.subr.bf16.mxu0 %v2449_v40  ;;  %v2496_v31 = vld [vmem:[#allocation7 + $0x120] sm:$0xff]   ;;  %v2505_v40 = vld [vmem:[#allocation7 + $0xc8] sm:$0xff]   ;;  %v2531_v10 = vld [vmem:[#allocation7 + $0x258] sm:$0xff]  }
  0x54   :  { %2234 = vmatprep.subr.bf16.mxu1 %v2451_v42  ;;  %v2507_v42 = vld [vmem:[#allocation7 + $0x148] sm:$0xff]  }
  0x55   :  { %790 = vmatmul.mubr.bf16.vlgmr.msra.gmra.mxu0 %v367_v37  ;;  %v2502_v37 = vld [vmem:[#allocation7 + $0x90] sm:$0xff]   ;;  %v2537_v16 = vld [vmem:[#allocation7 + $0x1c8] sm:$0xff]  }
  0x56   :  { %830 = vmatmul.mubr.bf16.vlgmr.msra.gmra.mxu1 %v369_v39  ;;  %2213 = vmatpush3.bf16.msra.mxu0 %v2450_v41  ;;  %v2504_v39 = vld [vmem:[#allocation7 + $0x110] sm:$0xff]   ;;  %v2506_v41 = vld [vmem:[#allocation7 + $0x88] sm:$0xff]  }
  0x57   :  { %2235 = vmatpush3.bf16.msra.mxu1 %v2452_v43  ;;  %2214 = vmatprep.subr.bf16.mxu0 %v2453_v44  ;;  %v2508_v43 = vld [vmem:[#allocation7 + $0x108] sm:$0xff]   ;;  %v2509_v44 = vld [vmem:[#allocation7 + $0xc0] sm:$0xff]  }
  0x58   :  { %2236 = vmatprep.subr.bf16.mxu1 %v2455_v46  ;;  %869 = vmatprep.mubr.bf16.mxu0 %v372_v8  ;;  %v2511_v46 = vld [vmem:[#allocation7 + $0x140] sm:$0xff]   ;;  %v2529_v8 = vld [vmem:[#allocation7 + $0x1d8] sm:$0xff]  }
  0x59   :  { %1677 = vmatprep.mubr.bf16.mxu1 %v90_v14  ;;  %v2535_v14 = vld [vmem:[#allocation7 + $0x250] sm:$0xff]  }
  0x5a   :  { %2215 = vmatpush3.bf16.msra.mxu0 %v2454_v45  ;;  %v2510_v45 = vld [vmem:[#allocation7 + $0x80] sm:$0xff]  }
  0x5b   :  { %2237 = vmatpush3.bf16.msra.mxu1 %v2456_v47  ;;  %2216 = vmatprep.subr.bf16.mxu0 %v2457_v48  ;;  %v76_v47 = vld [vmem:[#allocation2 + $0x18] sm:$0xff] }
  0x5c   :  { %2238 = vmatprep.subr.bf16.mxu1 %v2459_v50  ;;  %v92_v48 = vpack.c.bf16 %v76_v47, %v76_v47  ;;  %v75_v50 = vld [vmem:[#allocation2 + $0x10] sm:$0xff] }
  0x5d   :  { %v2560_v47 = vld [vmem:[#allocation7 + $0x320] sm:$0xff]  }
  0x5e   :  { %2217 = vmatpush3.bf16.msra.mxu0 %v2458_v49  ;;  %v2512_v49 = vld [vmem:[#allocation7 + $0x100] sm:$0xff]  }
  0x5f   :  { %2239 = vmatpush3.bf16.msra.mxu1 %v2460_v51  ;;  %2218 = vmatprep.subr.bf16.mxu0 %v2461_v52  ;;  %v91_v51 = vpack.c.bf16 %v75_v50, %v75_v50  ;;  %v2513_v52 = vld [vmem:[#allocation7 + $0x1f8] sm:$0xff]  }
  0x60   :  { %2240 = vmatprep.subr.bf16.mxu1 %v2463_v54  ;;  %v2563_v50 = vld [vmem:[#allocation7 + $0x358] sm:$0xff]  }
  0x62   :  { %2219 = vmatpush3.bf16.msra.mxu0 %v2462_v53  ;;  %v78_v53 = vld [vmem:[#allocation2 + $0x28] sm:$0xff] }
  0x63   :  { %2241 = vmatpush3.bf16.msra.mxu1 %v2464_v55  ;;  %2220 = vmatprep.subr.bf16.mxu0 %v2465_v56  ;;  %v94_v54 = vpack.c.bf16 %v78_v53, %v78_v53  ;;  %v2514_v55 = vld [vmem:[#allocation7 + $0x1b8] sm:$0xff]   ;;  %v77_v56 = vld [vmem:[#allocation2 + $0x20] sm:$0xff] }
  0x64   :  { %2242 = vmatprep.subr.bf16.mxu1 %v2467_v58  ;;  %v2515_v58 = vld [vmem:[#allocation7 + $0x278] sm:$0xff]   ;;  %v2566_v53 = vld [vmem:[#allocation7 + $0x290] sm:$0xff]  }
  0x66   :  { %2221 = vmatpush3.bf16.msra.mxu0 %v2466_v57  ;;  %v93_v57 = vpack.c.bf16 %v77_v56, %v77_v56  ;;  %v2569_v56 = vld [vmem:[#allocation7 + $0x2c8] sm:$0xff]  }
  0x67   :  { %2243 = vmatpush3.bf16.msra.mxu1 %v2468_v59  ;;  %2222 = vmatprep.subr.bf16.mxu0 %v2469_v60  ;;  %v2516_v59 = vld [vmem:[#allocation7 + $0x238] sm:$0xff]   ;;  %v2517_v60 = vld [vmem:[#allocation7 + $0x1f0] sm:$0xff]  }
  0x68   :  { %2244 = vmatprep.subr.bf16.mxu1 %v2471_v62  ;;  %v2519_v62 = vld [vmem:[#allocation7 + $0x270] sm:$0xff]  }
  0x6a   :  { %2223 = vmatpush3.bf16.msra.mxu0 %v2470_v61  ;;  %v2518_v61 = vld [vmem:[#allocation7 + $0x1b0] sm:$0xff]  }
  0x6b   :  { %2245 = vmatpush3.bf16.msra.mxu1 %v2472_v63  ;;  %2224 = vmatprep.subr.bf16.mxu0 %v2473_v0  ;;  %v2520_v63 = vld [vmem:[#allocation7 + $0x230] sm:$0xff]   ;;  %v2521_v0 = vld [vmem:[#allocation7 + $0x1e8] sm:$0xff]  }
  0x6c   :  { %2246 = vmatprep.subr.bf16.mxu1 %v2475_v2  ;;  %v2523_v2 = vld [vmem:[#allocation7 + $0x268] sm:$0xff]  }
  0x6e   :  { %2225 = vmatpush3.bf16.msra.mxu0 %v2474_v1  ;;  %v2522_v1 = vld [vmem:[#allocation7 + $0x1a8] sm:$0xff]  }
  0x6f   :  { %2247 = vmatpush3.bf16.msra.mxu1 %v2476_v3  ;;  %2226 = vmatprep.subr.bf16.mxu0 %v2477_v4  ;;  %v2524_v3 = vld [vmem:[#allocation7 + $0x228] sm:$0xff]   ;;  %v2525_v4 = vld [vmem:[#allocation7 + $0x1e0] sm:$0xff]  }
  0x70   :  { %2248 = vmatprep.subr.bf16.mxu1 %v2479_v6  ;;  %v2527_v6 = vld [vmem:[#allocation7 + $0x260] sm:$0xff]  }
  0x72   :  { %2227 = vmatpush3.bf16.msra.mxu0 %v2478_v5  ;;  %v2526_v5 = vld [vmem:[#allocation7 + $0x1a0] sm:$0xff]  }
  0x73   :  { %2249 = vmatpush3.bf16.msra.mxu1 %v2480_v9  ;;  %2256 = vmatprep.subr.bf16.mxu0 %v2481_v12  ;;  %v2530_v9 = vld [vmem:[#allocation7 + $0x198] sm:$0xff]   ;;  %v2533_v12 = vld [vmem:[#allocation7 + $0x1d0] sm:$0xff]  }
  0x74   :  { %2278 = vmatprep.subr.bf16.mxu1 %v2483_v18  ;;  %v2539_v18 = vld [vmem:[#allocation7 + $0x248] sm:$0xff]  }
  0x75   :  { %870 = vmatmul.mubr.bf16.vlgmr.msra.gmra.mxu0 %v371_v11  ;;  %v2532_v11 = vld [vmem:[#allocation7 + $0x218] sm:$0xff]  }
  0x76   :  { %2257 = vmatpush3.bf16.msra.mxu0 %v2482_v15  ;;  %1678 = vmatmul.mubr.bf16.vlgmr.msra.gmra.mxu1 %v89_v17  ;;  %v2536_v15 = vld [vmem:[#allocation7 + $0x210] sm:$0xff]   ;;  %v2538_v17 = vld [vmem:[#allocation7 + $0x188] sm:$0xff]  }
  0x77   :  { %2279 = vmatpush3.bf16.msra.mxu1 %v2484_v19  ;;  %2258 = vmatprep.subr.bf16.mxu0 %v2485_v20  ;;  %v2540_v19 = vld [vmem:[#allocation7 + $0x208] sm:$0xff]   ;;  %v2541_v20 = vld [vmem:[#allocation7 + $0x1c0] sm:$0xff]  }
  0x78   :  { %2280 = vmatprep.subr.bf16.mxu1 %v2487_v22  ;;  %1717 = vmatprep.mubr.bf16.mxu0 %v92_v48  ;;  %v2543_v22 = vld [vmem:[#allocation7 + $0x240] sm:$0xff]   ;;  %v2561_v48 = vld [vmem:[#allocation7 + $0x2d8] sm:$0xff]  }
  0x79   :  { %1757 = vmatprep.mubr.bf16.mxu1 %v94_v54  ;;  %v2567_v54 = vld [vmem:[#allocation7 + $0x350] sm:$0xff]  }
  0x7a   :  { %2259 = vmatpush3.bf16.msra.mxu0 %v2486_v21  ;;  %v2542_v21 = vld [vmem:[#allocation7 + $0x180] sm:$0xff]  }
  0x7b   :  { %2281 = vmatpush3.bf16.msra.mxu1 %v2488_v23  ;;  %2260 = vmatprep.subr.bf16.mxu0 %v2489_v24  ;;  %v80_v23 = vld [vmem:[#allocation2 + $0x38] sm:$0xff] }
  0x7c   :  { %2282 = vmatprep.subr.bf16.mxu1 %v2491_v26  ;;  %v96_v24 = vpack.c.bf16 %v80_v23, %v80_v23  ;;  %v79_v26 = vld [vmem:[#allocation2 + $0x30] sm:$0xff]  ;;  %v2590_v23 = vld [vmem:[#allocation7 + $0x388] sm:$0xff]  }
  0x7e   :  { %2261 = vmatpush3.bf16.msra.mxu0 %v2490_v25  ;;  %v2544_v25 = vld [vmem:[#allocation7 + $0x200] sm:$0xff]  }
  0x7f   :  { %2283 = vmatpush3.bf16.msra.mxu1 %v2492_v27  ;;  %2262 = vmatprep.subr.bf16.mxu0 %v2493_v28  ;;  %v95_v27 = vpack.c.bf16 %v79_v26, %v79_v26  ;;  %v2545_v28 = vld [vmem:[#allocation7 + $0x2f8] sm:$0xff]   ;;  %v87_v26 = vld [vmem:[#allocation2 + $0x70] sm:$0xff] }
  0x80   :  { %2284 = vmatprep.subr.bf16.mxu1 %v2495_v30 }
  0x82   :  { %2263 = vmatpush3.bf16.msra.mxu0 %v2494_v29  ;;  %v82_v29 = vld [vmem:[#allocation2 + $0x48] sm:$0xff] }
  0x83   :  { %2285 = vmatpush3.bf16.msra.mxu1 %v2496_v31  ;;  %2264 = vmatprep.subr.bf16.mxu0 %v2497_v32  ;;  %v98_v30 = vpack.c.bf16 %v82_v29, %v82_v29  ;;  %v2546_v31 = vld [vmem:[#allocation7 + $0x2b8] sm:$0xff]   ;;  %v81_v32 = vld [vmem:[#allocation2 + $0x40] sm:$0xff] }
  0x84   :  { %2286 = vmatprep.subr.bf16.mxu1 %v2499_v34  ;;  %v2547_v34 = vld [vmem:[#allocation7 + $0x378] sm:$0xff]  }
  0x86   :  { %2265 = vmatpush3.bf16.msra.mxu0 %v2498_v33  ;;  %v97_v33 = vpack.c.bf16 %v81_v32, %v81_v32 }
  0x87   :  { %2287 = vmatpush3.bf16.msra.mxu1 %v2500_v35  ;;  %2266 = vmatprep.subr.bf16.mxu0 %v2501_v36  ;;  %v2548_v35 = vld [vmem:[#allocation7 + $0x338] sm:$0xff]   ;;  %v2549_v36 = vld [vmem:[#allocation7 + $0x2f0] sm:$0xff]  }
  0x88   :  { %2288 = vmatprep.subr.bf16.mxu1 %v2503_v38  ;;  %v2551_v38 = vld [vmem:[#allocation7 + $0x370] sm:$0xff]  }
  0x8a   :  { %2267 = vmatpush3.bf16.msra.mxu0 %v2502_v37  ;;  %v2550_v37 = vld [vmem:[#allocation7 + $0x2b0] sm:$0xff]  }
  0x8b   :  { %2289 = vmatpush3.bf16.msra.mxu1 %v2504_v39  ;;  %2268 = vmatprep.subr.bf16.mxu0 %v2505_v40  ;;  %v2552_v39 = vld [vmem:[#allocation7 + $0x330] sm:$0xff]   ;;  %v2553_v40 = vld [vmem:[#allocation7 + $0x2e8] sm:$0xff]  }
  0x8c   :  { %2290 = vmatprep.subr.bf16.mxu1 %v2507_v42  ;;  %v2555_v42 = vld [vmem:[#allocation7 + $0x368] sm:$0xff]  }
  0x8e   :  { %2269 = vmatpush3.bf16.msra.mxu0 %v2506_v41  ;;  %v2554_v41 = vld [vmem:[#allocation7 + $0x2a8] sm:$0xff]  }
  0x8f   :  { %2291 = vmatpush3.bf16.msra.mxu1 %v2508_v43  ;;  %2270 = vmatprep.subr.bf16.mxu0 %v2509_v44  ;;  %v2556_v43 = vld [vmem:[#allocation7 + $0x328] sm:$0xff]   ;;  %v2557_v44 = vld [vmem:[#allocation7 + $0x2e0] sm:$0xff]  }
  0x90   :  { %2292 = vmatprep.subr.bf16.mxu1 %v2511_v46  ;;  %v2559_v46 = vld [vmem:[#allocation7 + $0x360] sm:$0xff]  }
  0x92   :  { %2271 = vmatpush3.bf16.msra.mxu0 %v2510_v45  ;;  %v2558_v45 = vld [vmem:[#allocation7 + $0x2a0] sm:$0xff]  }
  0x93   :  { %2293 = vmatpush3.bf16.msra.mxu1 %v2512_v49  ;;  %2300 = vmatprep.subr.bf16.mxu0 %v2513_v52  ;;  %v2562_v49 = vld [vmem:[#allocation7 + $0x298] sm:$0xff]   ;;  %v2565_v52 = vld [vmem:[#allocation7 + $0x2d0] sm:$0xff]  }
  0x94   :  { %2322 = vmatprep.subr.bf16.mxu1 %v2515_v58  ;;  %v2571_v58 = vld [vmem:[#allocation7 + $0x348] sm:$0xff]  }
  0x95   :  { %1718 = vmatmul.mubr.bf16.vlgmr.msra.gmra.mxu0 %v91_v51  ;;  %v2564_v51 = vld [vmem:[#allocation7 + $0x318] sm:$0xff]  }
  0x96   :  { %2301 = vmatpush3.bf16.msra.mxu0 %v2514_v55  ;;  %1758 = vmatmul.mubr.bf16.vlgmr.msra.gmra.mxu1 %v93_v57  ;;  %v2568_v55 = vld [vmem:[#allocation7 + $0x310] sm:$0xff]   ;;  %v2570_v57 = vld [vmem:[#allocation7 + $0x288] sm:$0xff]  }
  0x97   :  { %2323 = vmatpush3.bf16.msra.mxu1 %v2516_v59  ;;  %2302 = vmatprep.subr.bf16.mxu0 %v2517_v60  ;;  %v2572_v59 = vld [vmem:[#allocation7 + $0x308] sm:$0xff]   ;;  %v2573_v60 = vld [vmem:[#allocation7 + $0x2c0] sm:$0xff]  }
  0x98   :  { %2324 = vmatprep.subr.bf16.mxu1 %v2519_v62  ;;  %1797 = vmatprep.mubr.bf16.mxu0 %v96_v24  ;;  %v2575_v62 = vld [vmem:[#allocation7 + $0x340] sm:$0xff]  }
  0x99   :  { %1837 = vmatprep.mubr.bf16.mxu1 %v98_v30  ;;  %v2591_v24 = vld [vmem:[#allocation7 + $0x3c0] sm:$0xff]  }
  0x9a   :  { %2303 = vmatpush3.bf16.msra.mxu0 %v2518_v61  ;;  %v2574_v61 = vld [vmem:[#allocation7 + $0x280] sm:$0xff]  }
  0x9b   :  { %2325 = vmatpush3.bf16.msra.mxu1 %v2520_v63  ;;  %2304 = vmatprep.subr.bf16.mxu0 %v2521_v0  ;;  %v84_v63 = vld [vmem:[#allocation2 + $0x58] sm:$0xff] }
  0x9c   :  { %2326 = vmatprep.subr.bf16.mxu1 %v2523_v2  ;;  %v100_v0 = vpack.c.bf16 %v84_v63, %v84_v63  ;;  %v83_v2 = vld [vmem:[#allocation2 + $0x50] sm:$0xff] }
  0x9e   :  { %2305 = vmatpush3.bf16.msra.mxu0 %v2522_v1  ;;  %v2576_v1 = vld [vmem:[#allocation7 + $0x300] sm:$0xff]  }
  0x9f   :  { %2327 = vmatpush3.bf16.msra.mxu1 %v2524_v3  ;;  %2306 = vmatprep.subr.bf16.mxu0 %v2525_v4  ;;  %v99_v3 = vpack.c.bf16 %v83_v2, %v83_v2  ;;  %v2577_v4 = vld [vmem:[#allocation7 + $0x3f8] sm:$0xff]  }
  0xa0   :  { %2328 = vmatprep.subr.bf16.mxu1 %v2527_v6 }
  0xa2   :  { %2307 = vmatpush3.bf16.msra.mxu0 %v2526_v5  ;;  %v86_v5 = vld [vmem:[#allocation2 + $0x68] sm:$0xff] }
  0xa3   :  { %2329 = vmatpush3.bf16.msra.mxu1 %v2528_v7  ;;  %2308 = vmatprep.subr.bf16.mxu0 %v2529_v8  ;;  %v102_v6 = vpack.c.bf16 %v86_v5, %v86_v5  ;;  %v2578_v7 = vld [vmem:[#allocation7 + $0x3b8] sm:$0xff]   ;;  %v85_v8 = vld [vmem:[#allocation2 + $0x60] sm:$0xff] }
  0xa4   :  { %2330 = vmatprep.subr.bf16.mxu1 %v2531_v10  ;;  %v2579_v10 = vld [vmem:[#allocation7 + $0x3f0] sm:$0xff]  }
  0xa6   :  { %2309 = vmatpush3.bf16.msra.mxu0 %v2530_v9  ;;  %v101_v9 = vpack.c.bf16 %v85_v8, %v85_v8 }
  0xa7   :  { %2331 = vmatpush3.bf16.msra.mxu1 %v2532_v11  ;;  %2310 = vmatprep.subr.bf16.mxu0 %v2533_v12  ;;  %v2580_v11 = vld [vmem:[#allocation7 + $0x3b0] sm:$0xff]   ;;  %v2581_v12 = vld [vmem:[#allocation7 + $0x3e8] sm:$0xff]  }
  0xa8   :  { %2332 = vmatprep.subr.bf16.mxu1 %v2535_v14  ;;  %v2583_v14 = vld [vmem:[#allocation7 + $0x3e0] sm:$0xff]  }
  0xaa   :  { %2311 = vmatpush3.bf16.msra.mxu0 %v2534_v13  ;;  %v2582_v13 = vld [vmem:[#allocation7 + $0x3a8] sm:$0xff]  }
  0xab   :  { %2333 = vmatpush3.bf16.msra.mxu1 %v2536_v15  ;;  %2312 = vmatprep.subr.bf16.mxu0 %v2537_v16  ;;  %v2584_v15 = vld [vmem:[#allocation7 + $0x3a0] sm:$0xff]   ;;  %v2585_v16 = vld [vmem:[#allocation7 + $0x3d8] sm:$0xff]  }
  0xac   :  { %2334 = vmatprep.subr.bf16.mxu1 %v2539_v18  ;;  %v88_v18 = vld [vmem:[#allocation2 + $0x78] sm:$0xff] }
  0xae   :  { %2313 = vmatpush3.bf16.msra.mxu0 %v2538_v17  ;;  %v2586_v17 = vld [vmem:[#allocation7 + $0x398] sm:$0xff]  }
  0xaf   :  { %2335 = vmatpush3.bf16.msra.mxu1 %v2540_v19  ;;  %2314 = vmatprep.subr.bf16.mxu0 %v2541_v20  ;;  %v2587_v19 = vld [vmem:[#allocation7 + $0x3d0] sm:$0xff]   ;;  %v104_v20 = vpack.c.bf16 %v88_v18, %v88_v18 }
  0xb0   :  { %2336 = vmatprep.subr.bf16.mxu1 %v2543_v22  ;;  %v2589_v22 = vld [vmem:[#allocation7 + $0x3c8] sm:$0xff]  }
  0xb2   :  { %2315 = vmatpush3.bf16.msra.mxu0 %v2542_v21  ;;  %v2588_v21 = vld [vmem:[#allocation7 + $0x390] sm:$0xff]  }
  0xb3   :  { %2337 = vmatpush3.bf16.msra.mxu1 %v2544_v25  ;;  %2344 = vmatprep.subr.bf16.mxu0 %v2545_v28  ;;  %v2592_v25 = vld [vmem:[#allocation7 + $0x380] sm:$0xff]  }
  0xb4   :  { %2366 = vmatprep.subr.bf16.mxu1 %v2547_v34 }
  0xb5   :  { %1798 = vmatmul.mubr.bf16.vlgmr.msra.gmra.mxu0 %v95_v27  ;;  %v103_v27 = vpack.c.bf16 %v87_v26, %v87_v26 }
  0xb6   :  { %2345 = vmatpush3.bf16.msra.mxu0 %v2546_v31  ;;  %1838 = vmatmul.mubr.bf16.vlgmr.msra.gmra.mxu1 %v97_v33 }
  0xb7   :  { %2367 = vmatpush3.bf16.msra.mxu1 %v2548_v35  ;;  %2346 = vmatprep.subr.bf16.mxu0 %v2549_v36 }
  0xb8   :  { %2368 = vmatprep.subr.bf16.mxu1 %v2551_v38  ;;  %1877 = vmatprep.mubr.bf16.mxu0 %v100_v0 }
  0xb9   :  { %1917 = vmatprep.mubr.bf16.mxu1 %v102_v6 }
  0xba   :  { %2347 = vmatpush3.bf16.msra.mxu0 %v2550_v37 }
  0xbb   :  { %2369 = vmatpush3.bf16.msra.mxu1 %v2552_v39  ;;  %2348 = vmatprep.subr.bf16.mxu0 %v2553_v40 }
  0xbc   :  { %2370 = vmatprep.subr.bf16.mxu1 %v2555_v42 }
  0xbe   :  { %2349 = vmatpush3.bf16.msra.mxu0 %v2554_v41 }
  0xbf   :  { %2371 = vmatpush3.bf16.msra.mxu1 %v2556_v43  ;;  %2350 = vmatprep.subr.bf16.mxu0 %v2557_v44 }
  0xc0   :  { %2372 = vmatprep.subr.bf16.mxu1 %v2559_v46 }
  0xc2   :  { %2351 = vmatpush3.bf16.msra.mxu0 %v2558_v45 }
  0xc3   :  { %2373 = vmatpush3.bf16.msra.mxu1 %v2560_v47  ;;  %2352 = vmatprep.subr.bf16.mxu0 %v2561_v48 }
  0xc4   :  { %2374 = vmatprep.subr.bf16.mxu1 %v2563_v50 }
  0xc6   :  { %2353 = vmatpush3.bf16.msra.mxu0 %v2562_v49 }
  0xc7   :  { %2375 = vmatpush3.bf16.msra.mxu1 %v2564_v51  ;;  %2354 = vmatprep.subr.bf16.mxu0 %v2565_v52 }
  0xc8   :  { %2376 = vmatprep.subr.bf16.mxu1 %v2567_v54 }
  0xca   :  { %2355 = vmatpush3.bf16.msra.mxu0 %v2566_v53 }
  0xcb   :  { %2377 = vmatpush3.bf16.msra.mxu1 %v2568_v55  ;;  %2356 = vmatprep.subr.bf16.mxu0 %v2569_v56 }
  0xcc   :  { %2378 = vmatprep.subr.bf16.mxu1 %v2571_v58 }
  0xce   :  { %2357 = vmatpush3.bf16.msra.mxu0 %v2570_v57 }
  0xcf   :  { %2379 = vmatpush3.bf16.msra.mxu1 %v2572_v59  ;;  %2358 = vmatprep.subr.bf16.mxu0 %v2573_v60 }
  0xd0   :  { %2380 = vmatprep.subr.bf16.mxu1 %v2575_v62 }
  0xd2   :  { %2359 = vmatpush3.bf16.msra.mxu0 %v2574_v61 }
  0xd3   :  { %2381 = vmatpush3.bf16.msra.mxu1 %v2576_v1  ;;  %2388 = vmatprep.subr.bf16.mxu0 %v2577_v4 }
  0xd5   :  { %1878 = vmatmul.mubr.bf16.vlgmr.msra.gmra.mxu0 %v99_v3 }
  0xd6   :  { %2389 = vmatpush3.bf16.msra.mxu0 %v2578_v7  ;;  %1918 = vmatmul.mubr.bf16.vlgmr.msra.gmra.mxu1 %v101_v9 }
  0xd7   :  { %2390 = vmatprep.subr.bf16.mxu0 %v2579_v10  ;;  %1957 = vmatprep.mubr.bf16.mxu0 %v104_v20 }
  0xda   :  { %2391 = vmatpush3.bf16.msra.mxu0 %v2580_v11 }
  0xdb   :  { %2392 = vmatprep.subr.bf16.mxu0 %v2581_v12 }
  0xde   :  { %2393 = vmatpush3.bf16.msra.mxu0 %v2582_v13 }
  0xdf   :  { %2394 = vmatprep.subr.bf16.mxu0 %v2583_v14 }
  0xe2   :  { %2395 = vmatpush3.bf16.msra.mxu0 %v2584_v15 }
  0xe3   :  { %2396 = vmatprep.subr.bf16.mxu0 %v2585_v16 }
  0xe6   :  { %2397 = vmatpush3.bf16.msra.mxu0 %v2586_v17 }
  0xe7   :  { %2398 = vmatprep.subr.bf16.mxu0 %v2587_v19 }
  0xea   :  { %2399 = vmatpush3.bf16.msra.mxu0 %v2588_v21 }
  0xeb   :  { %2400 = vmatprep.subr.bf16.mxu0 %v2589_v22 }
  0xee   :  { %2401 = vmatpush3.bf16.msra.mxu0 %v2590_v23 }
  0xef   :  { %2402 = vmatprep.subr.bf16.mxu0 %v2591_v24 }
  0xf2   :  { %2403 = vmatpush3.bf16.msra.mxu0 %v2592_v25 }
  0xf5   :  { %1958 = vmatmul.mubr.bf16.vlgmr.msra.gmra.mxu0 %v103_v27  ;;  %v2167_v27 = vld [vmem:[%s2760_s4] ss:$0 sm:$0xff] }
 0x115   :  { %v2184_v28 = vpop.f32.mrf.mxu0 }
 0x116   :  { %v2206_v29 = vpop.f32.mrf.mxu1 }
 0x117   :  { %v2185_v30 = vpop.f32.mrf.mxu0 }
 0x118   :  { %v2207_v31 = vpop.f32.mrf.mxu1  ;;  %v2186_v32 = vadd.f32 %v2185_v30, %v2184_v28 }
 0x119   :  { %v2208_v33 = vadd.f32 %v2207_v31, %v2206_v29  ;;  %v2187_v34 = vpop.f32.mrf.mxu0 }
 0x11a   :  { %v2209_v35 = vpop.f32.mrf.mxu1 }
 0x11b   :  { %v832_v36 = vadd.f32 %v2208_v33, %v2186_v32  ;;  %v2188_v37 = vpop.f32.mrf.mxu0 }
 0x11c   :  { %v2210_v38 = vpop.f32.mrf.mxu1 }
 0x135   :  { %v2228_v39 = vpop.f32.mrf.mxu0 }
 0x136   :  { %v2250_v41 = vpop.f32.mrf.mxu1 }
 0x137   :  { %v2229_v40 = vpop.f32.mrf.mxu0 }
 0x138   :  { %v2230_v42 = vadd.f32 %v2229_v40, %v2228_v39  ;;  %v2251_v44 = vpop.f32.mrf.mxu1 }
 0x139   :  { %v2231_v43 = vpop.f32.mrf.mxu0  ;;  %v2252_v46 = vadd.f32 %v2251_v44, %v2250_v41 }
 0x13a   :  { %v872_v45 = vadd.f32 %v2230_v42, %v832_v36  ;;  %v2253_v48 = vpop.f32.mrf.mxu1 }
 0x13b   :  { %v2232_v47 = vpop.f32.mrf.mxu0 }
 0x13c   :  { %v1680_v49 = vadd.f32 %v2252_v46, %v872_v45  ;;  %v2254_v50 = vpop.f32.mrf.mxu1 }
 0x155   :  { %v2272_v51 = vpop.f32.mrf.mxu0 }
 0x156   :  { %v2294_v53 = vpop.f32.mrf.mxu1 }
 0x157   :  { %v2273_v52 = vpop.f32.mrf.mxu0 }
 0x158   :  { %v2274_v54 = vadd.f32 %v2273_v52, %v2272_v51  ;;  %v2295_v56 = vpop.f32.mrf.mxu1 }
 0x159   :  { %v2275_v55 = vpop.f32.mrf.mxu0  ;;  %v2296_v58 = vadd.f32 %v2295_v56, %v2294_v53 }
 0x15a   :  { %v1720_v57 = vadd.f32 %v2274_v54, %v1680_v49  ;;  %v2297_v60 = vpop.f32.mrf.mxu1 }
 0x15b   :  { %v2276_v59 = vpop.f32.mrf.mxu0 }
 0x15c   :  { %v1760_v61 = vadd.f32 %v2296_v58, %v1720_v57  ;;  %v2298_v62 = vpop.f32.mrf.mxu1 }
 0x175   :  { %v2316_v63 = vpop.f32.mrf.mxu0 }
 0x176   :  { %v2338_v1 = vpop.f32.mrf.mxu1 }
 0x177   :  { %v2317_v0 = vpop.f32.mrf.mxu0 }
 0x178   :  { %v2339_v3 = vpop.f32.mrf.mxu1  ;;  %v2318_v15 = vadd.f32 %v2317_v0, %v2316_v63 }
 0x179   :  { %v2319_v2 = vpop.f32.mrf.mxu0  ;;  %v2340_v17 = vadd.f32 %v2339_v3, %v2338_v1 }
 0x17a   :  { %v2341_v5 = vpop.f32.mrf.mxu1  ;;  %v1800_v16 = vadd.f32 %v2318_v15, %v1760_v61 }
 0x17b   :  { %v2320_v4 = vpop.f32.mrf.mxu0 }
 0x17c   :  { %v2342_v6 = vpop.f32.mrf.mxu1  ;;  %v1840_v19 = vadd.f32 %v2340_v17, %v1800_v16 }
 0x195   :  { %v2360_v7 = vpop.f32.mrf.mxu0 }
 0x196   :  { %v2382_v9 = vpop.f32.mrf.mxu1 }
 0x197   :  { %v2361_v8 = vpop.f32.mrf.mxu0 }
 0x198   :  { %v2383_v11 = vpop.f32.mrf.mxu1  ;;  %v2362_v18 = vadd.f32 %v2361_v8, %v2360_v7 }
 0x199   :  { %v2363_v10 = vpop.f32.mrf.mxu0  ;;  %v2384_v21 = vadd.f32 %v2383_v11, %v2382_v9 }
 0x19a   :  { %v2385_v13 = vpop.f32.mrf.mxu1  ;;  %v1880_v20 = vadd.f32 %v2362_v18, %v1840_v19 }
 0x19b   :  { %v2364_v12 = vpop.f32.mrf.mxu0 }
 0x19c   :  { %v2386_v14 = vpop.f32.mrf.mxu1  ;;  %v1920_v24 = vadd.f32 %v2384_v21, %v1880_v20 }
 0x1b5   :  { %v2404_v22 = vpop.f32.mrf.mxu0 }
 0x1b7   :  { %v2405_v23 = vpop.f32.mrf.mxu0 }
 0x1b8   :  { %v2406_v25 = vadd.f32 %v2405_v23, %v2404_v22 }
 0x1b9   :  { %v2407_v26 = vpop.f32.mrf.mxu0 }
 0x1ba   :  { %v1960_v28 = vadd.f32 %v2406_v25, %v1920_v24 }
 0x1bb   :  { %v2408_v29 = vpop.f32.mrf.mxu0 }
 0x1bc   :  { %v1972_v30 = vadd.f32 %v2167_v27, %v1960_v28 }
 0x1be   :  { %1973 = vst [vmem:[#allocation10] sm:$0xff] %v1972_v30 }
 0x1bf   :  { %2684 = shalt.err (!%p2681_p10)
}
 0x1c0   :  { %1983 = dma.vmem_to_hbm [thread:$0]  %s1981_s14, 128, %s2761_s5, [#allocation4]  }
 0x1c1   :  { %2699 = dma.done.wait [#allocation4], 128  }
 0x1c2   :  { %2700 = vsyncadd [#allocation4], 4294967168 }
 0x1c3   :  { %1987 = vsyncpa [#allocation3], 1 }
 0x1c4   :  { %1988 = vsyncpa [#allocation6], 1 }
 0x1c5   :  { %1989 = vsyncpa [#allocation9], 1 }
 0x1c6   :  { %1990 = vsyncpa [#allocation4], 1 }

</bundles_post_ra>
